<compile_context>
chip_gen: v7x
topology: tpu7x:2x2x1
jax: 0.10.0
libtpu: 0.0.40
codegen_flags: <defaults>
</compile_context>

<pallas_src>
import math
import numpy as np

import jax
import jax.numpy as jnp
from jax import lax
from jax.experimental import pallas as pl
from jax.experimental.pallas import tpu as pltpu


# --------------------------------------------------------------------------- kernel
def conv3x3_s2_kernel(x_ref, w_ref, b_ref, o_ref):
    """One MXU dot per grid step: tap-packed im2col rows @ flattened weights + bias.

    x_ref: (TM, K)    bf16  im2col rows, K = 9*Cin packed along lanes (contiguous, no relayout)
    w_ref: (K, Cout)  bf16  flattened 3x3 weights (tap-major, matches im2col channel order)
    b_ref: (1, Cout)  f32   bias
    o_ref: (TM, Cout) f32   output rows
    """
    acc = jnp.dot(x_ref[...], w_ref[...], preferred_element_type=jnp.float32)
    o_ref[...] = (acc + b_ref[...]).astype(o_ref.dtype)


# --------------------------------------------------------------------------- helpers
def _tpu_info():
    try:
        return pltpu.get_tpu_info()
    except Exception:
        return None


def _num_tensorcores():
    info = _tpu_info()
    for name in ("num_tensorcores", "tensorcore_count", "num_cores", "cores_per_chip"):
        v = getattr(info, name, None) if info is not None else None
        if isinstance(v, int) and v > 0:
            return v
    # Fallback 2: costs one extra ~0.35us grid step on single-core chips (v5e/v6e),
    # but keeps the second TensorCore busy on v7x.
    return 2


def _vmem_budget_bytes():
    info = _tpu_info()
    cap = getattr(info, "vmem_capacity_bytes", None) if info is not None else None
    if not isinstance(cap, int) or cap <= 0:
        cap = 64 * 1024 * 1024          # v7x physical floor; safe on every generation
    return min(cap // 4, 16 * 1024 * 1024)


def _pick_row_tile(M, Kc, Cout, num_cores, vmem_budget, max_rows=512):
    """Largest row tile TM (multiple of 8, divisor of M, <= max_rows) that fits the VMEM
    budget and, when possible, still leaves >= num_cores grid steps."""
    def fits(tm):
        # double-buffered input + output blocks, plus (replicated) weight/bias blocks
        fp = 2 * tm * Kc * 2 + 2 * tm * Cout * 4 + 2 * Kc * Cout * 2 + 2 * Cout * 4
        return fp <= vmem_budget

    feasible = [tm for tm in range(8, min(M, max_rows) + 1, 8)
                if M % tm == 0 and fits(tm)]
    if not feasible:
        # TODO(synk): for exotic shapes (M not a multiple of 8, or a single 8-row tile
        # over budget) pad M in the wrapper instead of using a full-extent block.
        return M
    core_aware = [tm for tm in feasible if (M // tm) >= num_cores]
    return max(core_aware) if core_aware else max(feasible)


# --------------------------------------------------------------------------- wrapper
def layer_transition_forward(x_nchw, w_hwio, b):
    """LayerTransition forward: 3x3 stride-2 pad-1 conv + bias.  NCHW in / NCHW out."""
    N, Cin, H, W = x_nchw.shape
    K, Cout = w_hwio.shape[0], w_hwio.shape[3]
    assert K == 3 and w_hwio.shape[1] == 3 and w_hwio.shape[2] == Cin
    stride, pad = 2, 1
    Ho = (H + 2 * pad - K) // stride + 1
    Wo = (W + 2 * pad - K) // stride + 1
    Kc = K * K * Cin
    M = N * Ho * Wo

    # ---- wrapper-side layout plumbing (no compute) ----
    # TODO(synk): if the downstream consumer accepts NHWC, both transposes can be dropped;
    # kept to preserve the PyTorch NCHW contract.
    x = jnp.transpose(x_nchw, (0, 2, 3, 1))                        # NCHW -> NHWC
    xp = jnp.pad(x, ((0, 0), (pad, pad), (pad, pad), (0, 0)))
    # Tap-packed im2col: each conv tap becomes a contiguous channel group, so the kernel
    # never slices/reshapes across (8,128) tile boundaries.
    taps = []
    for di in range(K):
        for dj in range(K):
            taps.append(lax.slice(
                xp, (0, di, dj, 0),
                (N, di + stride * (Ho - 1) + 1, dj + stride * (Wo - 1) + 1, Cin),
                (1, stride, stride, 1)))                            # (N, Ho, Wo, Cin)
    patches = jnp.concatenate(taps, axis=-1)                        # (N, Ho, Wo, 9*Cin)
    xm = patches.reshape(M, Kc).astype(jnp.bfloat16)                # contiguous merge
    wm = w_hwio.reshape(Kc, Cout).astype(jnp.bfloat16)              # tap-major: matches xm
    b2 = jnp.asarray(b, jnp.float32).reshape(1, Cout)

    tm = _pick_row_tile(M, Kc, Cout, _num_tensorcores(), _vmem_budget_bytes())
    grid = (M // tm,)

    cost = pl.CostEstimate(
        flops=2 * M * Kc * Cout,
        transcendentals=0,
        bytes_accessed=M * Kc * 2 + Kc * Cout * 2 + Cout * 4 + M * Cout * 4)

    out2d = pl.pallas_call(
        conv3x3_s2_kernel,
        out_shape=jax.ShapeDtypeStruct((M, Cout), jnp.float32),
        grid=grid,
        in_specs=[
            pl.BlockSpec((tm, Kc), lambda i: (i, 0)),
            pl.BlockSpec((Kc, Cout), lambda i: (0, 0)),
            pl.BlockSpec((1, Cout), lambda i: (0, 0)),
        ],
        out_specs=pl.BlockSpec((tm, Cout), lambda i: (i, 0)),
        compiler_params=pltpu.CompilerParams(dimension_semantics=("parallel",)),
        cost_estimate=cost,
    )(xm, wm, b2)

    out = out2d.reshape(N, Ho, Wo, Cout)
    return jnp.transpose(out, (0, 3, 1, 2))                         # NHWC -> NCHW


# --------------------------------------------------------------------------- reference
def ref_layer_transition(x_nchw, w_hwio, b):
    x = jnp.transpose(x_nchw, (0, 2, 3, 1)).astype(jnp.float32)
    y = lax.conv_general_dilated(
        x, w_hwio, (2, 2), [(1, 1), (1, 1)],
        dimension_numbers=("NHWC", "HWIO", "NHWC"),
        precision=lax.Precision.HIGHEST) + b.reshape(1, 1, 1, -1)
    return jnp.transpose(y, (0, 3, 1, 2))


# --------------------------------------------------------------------------- main
if __name__ == "__main__":
    key = jax.random.PRNGKey(0)
    kx, kw, kb = jax.random.split(key, 3)

    # Module defaults: patch_size=3, stride=2, in_chans=64, embed_dim=64; small spatial size.
    N, Cin, H, W = 2, 64, 16, 16
    Cout, K = 64, 3

    x = jax.random.normal(kx, (N, Cin, H, W), jnp.float32)
    # Synthetic conv weights in HWIO with the module's init std sqrt(2 / (k*k*out_chs)).
    w = (math.sqrt(2.0 / (K * K * Cout))
         * jax.random.normal(kw, (K, K, Cin, Cout))).astype(jnp.float32)
    # PyTorch init zeroes the bias; use a small random bias so the bias path is exercised.
    b = (0.02 * jax.random.normal(kb, (Cout,))).astype(jnp.float32)

    fwd = jax.jit(lambda xx: layer_transition_forward(xx, w, b))
    out = jax.block_until_ready(fwd(x))                  # (N, Cout, H//2, W//2)

    ref = jax.block_until_ready(ref_layer_transition(x, w, b))
    # bf16 MXU operands with f32 accumulation vs f32 HIGHEST reference -> loose-ish tol.
    np.testing.assert_allclose(np.asarray(out), np.asarray(ref), rtol=3e-2, atol=3e-2)

    print("KERNEL_OK")
</pallas_src>

<mosaic_0001>
module attributes {stable_mosaic.version = 11 : i64} {
  func.func @conv3x3_s2_kernel(%arg0: i32, %arg1: memref<64x576xbf16, #tpu.memory_space<vmem>>, %arg2: memref<576x64xbf16, #tpu.memory_space<vmem>>, %arg3: memref<1x64xf32, #tpu.memory_space<vmem>>, %arg4: memref<64x64xf32, #tpu.memory_space<vmem>>) attributes {dimension_semantics = [#tpu.dimension_semantics<parallel>], iteration_bounds = array<i64: 2>, scalar_prefetch = 0 : i64, scratch_operands = 0 : i64, tpu.core_type = #tpu.core_type<tc>, window_params = [{transform_indices = @transform_0, window_bounds = array<i64: 64, 576>}, {pipeline_mode = #tpu.pipeline_mode<synchronous>, transform_indices = @transform_1, window_bounds = array<i64: 576, 64>}, {pipeline_mode = #tpu.pipeline_mode<synchronous>, transform_indices = @transform_2, window_bounds = array<i64: 1, 64>}, {transform_indices = @transform_3, window_bounds = array<i64: 64, 64>}]} {
    %c0 = arith.constant 0 : index
    %c0_0 = arith.constant 0 : index
    %0 = vector.load %arg1[%c0, %c0_0] : memref<64x576xbf16, #tpu.memory_space<vmem>>, vector<64x576xbf16>
    %c0_1 = arith.constant 0 : index
    %c0_2 = arith.constant 0 : index
    %1 = vector.load %arg2[%c0_1, %c0_2] : memref<576x64xbf16, #tpu.memory_space<vmem>>, vector<576x64xbf16>
    %cst = arith.constant dense<0.000000e+00> : vector<64x64xf32>
    %2 = tpu.matmul %0, %1, %cst {dimension_numbers = #tpu.dot_dimension_numbers<[1], [0], [0], [1], [0, 0, 1, 1], [], []>} : vector<64x576xbf16>, vector<576x64xbf16>, vector<64x64xf32> -> vector<64x64xf32>
    %c0_3 = arith.constant 0 : index
    %c0_4 = arith.constant 0 : index
    %3 = vector.load %arg3[%c0_3, %c0_4] : memref<1x64xf32, #tpu.memory_space<vmem>>, vector<1x64xf32>
    %4 = vector.broadcast %3 : vector<1x64xf32> to vector<64x64xf32>
    %5 = arith.addf %2, %4 : vector<64x64xf32>
    %c0_5 = arith.constant 0 : index
    %c0_6 = arith.constant 0 : index
    %6 = vector.load %arg4[%c0_5, %c0_6] : memref<64x64xf32, #tpu.memory_space<vmem>>, vector<64x64xf32>
    tpu.vector_store %arg4[%c0_5, %c0_6], %5 {strides = array<i32>} : memref<64x64xf32, #tpu.memory_space<vmem>>, vector<64x64xf32>,
    return
  }
  func.func @transform_0(%arg0: i32) -> (i32, i32) {
    %c0_i32 = arith.constant 0 : i32
    %c0_i32_0 = arith.constant 0 : i32
    return %arg0, %c0_i32 : i32, i32
  }
  func.func @transform_1(%arg0: i32) -> (i32, i32) {
    %c0_i32 = arith.constant 0 : i32
    %c0_i32_0 = arith.constant 0 : i32
    %c0_i32_1 = arith.constant 0 : i32
    return %c0_i32, %c0_i32_0 : i32, i32
  }
  func.func @transform_2(%arg0: i32) -> (i32, i32) {
    %c0_i32 = arith.constant 0 : i32
    %c0_i32_0 = arith.constant 0 : i32
    %c0_i32_1 = arith.constant 0 : i32
    return %c0_i32, %c0_i32_0 : i32, i32
  }
  func.func @transform_3(%arg0: i32) -> (i32, i32) {
    %c0_i32 = arith.constant 0 : i32
    %c0_i32_0 = arith.constant 0 : i32
    return %arg0, %c0_i32 : i32, i32
  }
}

</mosaic_0001>

<bundles_post_ra>
// kernel: _lambda_.1
= control target key start
LH: loop header
LB: loop body
LE: loop exit
PB: predicated region body
PF: predicated region fallthrough
CT: control target
= control target key end

     0   :  { %8 = vsyncpa [#allocation3], 0  ;;  %s1520_s0 = inlined_call_operand.vmem [shape: bf16[128,576], index: 0, kind: input, shape index: {}]   ;;  %s1521_s1 = inlined_call_operand.vmem [shape: bf16[576,64], index: 1, kind: input, shape index: {}]   ;;  %s1522_s2 = inlined_call_operand.vmem [shape: f32[1,64], index: 2, kind: input, shape index: {}]   ;;  %s1523_s3 = inlined_call_operand.hbm [shape: f32[128,64], index: 3, kind: output, shape index: {}]  }
   0x1   :  { %10 = vsyncpa [#allocation3 + $0x1], 0  ;;  %s1266_s12 = smov 0   ;;  %s1268_s13 = smov 0  }
   0x2   :  { %s1270_s14 = smov 0   ;;  %s1272_s15 = smov 0  }
   0x3 LB: > { %s1287_s16 = sadd.s32 4294967295, %s1241_s15   ;;  %s887_s17 = sadd.s32 4294967294, %s1241_s15   ;;  %s1241_s15 = sphi %s1272_s15, %s1529_s15   ;;  %s1237_s14 = sphi %s1270_s14, %s1528_s14   ;;  %s1233_s13 = sphi %s1268_s13, %s1527_s13   ;;  %s1229_s12 = sphi %s1266_s12, %s1526_s12  }
   0x4   : > { %s1291_s18 = sadd.s32 1, %s1241_s15   ;;  %s91_s19 = sadd.s32 1, %s1237_s14 }
   0x5   : > { %s88_s20 = ssub.s32 %s1241_s15, %s1291_s18  ;;  %p101_p0 = scmp.ne.s32.totalorder %s1237_s14, %s1233_s13 }
   0x6   : > { %p89_p1 = scmp.eq.s32.totalorder %s88_s20, 0  ;;  %p102_p2 = scmp.eq.s32.totalorder %s1287_s16, 1 }
   0x7   : > { %p107_p3 = scmp.ne.s32.totalorder %s1233_s13, %s1229_s12  ;;  %p108_p4 = scmp.eq.s32.totalorder %s887_s17, 1 }
   0x8   : > { %s1302_s21 = scalar_select %p89_p1, %s1237_s14, %s91_s19  }
   0x9   : > { %p1304_p5 = por %p102_p2, %p101_p0  ;;  %p1308_p6 = por %p108_p4, %p107_p3 }
   0xa   : > { %p890_p7 = scmp.ge.s32.totalorder %s1241_s15, 1  ;;  %p142_p8 = scmp.lt.s32.totalorder %s1241_s15, 3 }
   0xc   : > { %p143_p9 = pnand %p890_p7, %p142_p8 }
   0xd   : > { %v1115_v0 = vld [vmem:[%s1521_s1 + $0x40] sm:$0xff] (!%p143_p9)   ;;  %v1119_v4 = vld [vmem:[%s1521_s1 + $0x48] sm:$0xff] (!%p143_p9)   ;;  %v1123_v8 = vld [vmem:[%s1521_s1 + $0x50] sm:$0xff] (!%p143_p9)   ;;  %s892_s9 = sshll.u32 (!%p143_p9), %s1287_s16, 3  ;;  %vm595_vm0 = vcmask (!%p143_p9), 523264   ;;  %s164_s5 = sand.u32 (!%p143_p9), 1, %s1233_s13  }
   0xe   : > { %146 = sbr.rel (%p143_p9) target bundleno = 312 (0x138), region = 32  ;;  %v1116_v1 = vld [vmem:[%s1521_s1 + $0xc0] sm:$0xff] (!%p143_p9)   ;;  %961 = vmatprep.subr.bf16.mxu0 (!%p143_p9), %v1115_v0  ;;  %v1120_v5 = vld [vmem:[%s1521_s1 + $0xc8] sm:$0xff] (!%p143_p9)   ;;  %v1124_v9 = vld [vmem:[%s1521_s1 + $0xd0] sm:$0xff] (!%p143_p9)   ;;  %p168_p10 = scmp.lt.s32.totalorder (!%p143_p9), %s892_s9, 15 }
   0xf   : > { %v1117_v2 = vld [vmem:[%s1521_s1] sm:$0xff] (!%p143_p9)   ;;  %1001 = vmatprep.subr.bf16.mxu1 (!%p143_p9), %v1116_v1  ;;  %v1121_v6 = vld [vmem:[%s1521_s1 + $0x8] sm:$0xff] (!%p143_p9)   ;;  %v1125_v10 = vld [vmem:[%s1521_s1 + $0x10] sm:$0xff] (!%p143_p9)   ;;  %s960_s6 = sshll.u32 (!%p143_p9), %s1287_s16, 10  ;;  %s1479_s17 = scalar_lea.sflag (!%p143_p9), [#allocation3], %s164_s5 }
  0x10   : > { %v1118_v3 = vld [vmem:[%s1521_s1 + $0x80] sm:$0xff] (!%p143_p9)   ;;  %962 = vmatpush3.bf16.msra.mxu0 (!%p143_p9), %v1117_v2  ;;  %v1122_v7 = vld [vmem:[%s1521_s1 + $0x88] sm:$0xff] (!%p143_p9)   ;;  %v1126_v11 = vld [vmem:[%s1521_s1 + $0x90] sm:$0xff] (!%p143_p9)   ;;  %s1468_s11 = scalar_lea.hbm (!%p143_p9), %s1523_s3, %s960_s6  ;;  %s1243_s20 = smov (!%p143_p9), [#allocation2]  }
  0x11   : > { %1002 = vmatpush3.bf16.msra.mxu1 (!%p143_p9), %v1118_v3  ;;  %963 = vmatprep.subr.bf16.mxu0 (!%p143_p9), %v1119_v4  ;;  %v1127_v12 = vld [vmem:[%s1521_s1 + $0x58] sm:$0xff] (!%p143_p9)   ;;  %v1131_v16 = vld [vmem:[%s1521_s1 + $0x60] sm:$0xff] (!%p143_p9)   ;;  %v1135_v20 = vld [vmem:[%s1521_s1 + $0x68] sm:$0xff] (!%p143_p9)  }
  0x12   : > { %1003 = vmatprep.subr.bf16.mxu1 (!%p143_p9), %v1120_v5  ;;  %v1128_v13 = vld [vmem:[%s1521_s1 + $0xd8] sm:$0xff] (!%p143_p9)   ;;  %v1132_v17 = vld [vmem:[%s1521_s1 + $0xe0] sm:$0xff] (!%p143_p9)   ;;  %v1136_v21 = vld [vmem:[%s1521_s1 + $0xe8] sm:$0xff] (!%p143_p9)  }
  0x13   : > { %v1129_v14 = vld [vmem:[%s1521_s1 + $0x18] sm:$0xff] (!%p143_p9)   ;;  %v1133_v18 = vld [vmem:[%s1521_s1 + $0x20] sm:$0xff] (!%p143_p9)   ;;  %v1137_v22 = vld [vmem:[%s1521_s1 + $0x28] sm:$0xff] (!%p143_p9)  }
  0x14   : > { %964 = vmatpush3.bf16.msra.mxu0 (!%p143_p9), %v1121_v6  ;;  %v1130_v15 = vld [vmem:[%s1521_s1 + $0x98] sm:$0xff] (!%p143_p9)   ;;  %v1134_v19 = vld [vmem:[%s1521_s1 + $0xa0] sm:$0xff] (!%p143_p9)   ;;  %v1138_v23 = vld [vmem:[%s1521_s1 + $0xa8] sm:$0xff] (!%p143_p9)  }
  0x15   : > { %1004 = vmatpush3.bf16.msra.mxu1 %v1122_v7  ;;  %965 = vmatprep.subr.bf16.mxu0 %v1123_v8  ;;  %s1531_s9 = smov (!%p168_p10, %s892_s9), 15  ;;  %v1139_v24 = vld [vmem:[%s1521_s1 + $0x70] sm:$0xff]   ;;  %v1143_v28 = vld [vmem:[%s1521_s1 + $0x78] sm:$0xff]   ;;  %v1153_v36 = vld [vmem:[%s1521_s1 + $0x100] sm:$0xff]  }
  0x16   : > { %1005 = vmatprep.subr.bf16.mxu1 %v1124_v9  ;;  %v1140_v25 = vld [vmem:[%s1521_s1 + $0xf0] sm:$0xff]   ;;  %s1073_s24 = smul.u32 20, %s1531_s9  ;;  %v1144_v29 = vld [vmem:[%s1521_s1 + $0xf8] sm:$0xff]   ;;  %v1160_v39 = vld [vmem:[%s1521_s1 + $0x108] sm:$0xff]   ;;  %s891_s9 = sshll.u32 %s164_s5, 6 }
  0x17   : > { %v1141_v26 = vld [vmem:[%s1521_s1 + $0x30] sm:$0xff]   ;;  %v1145_v30 = vld [vmem:[%s1521_s1 + $0x38] sm:$0xff]   ;;  %v894_v58 = vld [vmem:[%s1522_s2] ss:$0 sm:$0xff] }
  0x18   : > { %966 = vmatpush3.bf16.msra.mxu0 %v1125_v10  ;;  %v1142_v27 = vld [vmem:[%s1521_s1 + $0xb0] sm:$0xff]   ;;  %s1408_s7 = scalar_lea.vmem %s1520_s0, %s1073_s24  ;;  %v1146_v31 = vld [vmem:[%s1521_s1 + $0xb8] sm:$0xff]   ;;  %s1183_s24 = sshll.u32 %s1243_s20, 4  ;;  %s1184_s24 = int_to_ptr.vmem [resolvable:$false] %s1183_s24 }
  0x19   : > { %1006 = vmatpush3.bf16.msra.mxu1 %v1126_v11  ;;  %967 = vmatprep.subr.bf16.mxu0 %v1127_v12  ;;  %v1147_v32 = vld [vmem:[%s1408_s7] ss:$20 sps:$4 sm:$0xff]   ;;  %v1149_v33 = vld [vmem:[%s1408_s7 + $0x4] ss:$20 sps:$4 sm:$0xff]   ;;  %v1150_v34 = vld [vmem:[%s1408_s7 + $0x8] ss:$20 sps:$4 sm:$0xff]  }
  0x1a   : > { %1007 = vmatprep.subr.bf16.mxu1 %v1128_v13  ;;  %v1152_v35 = vld [vmem:[%s1408_s7 + $0xc] ss:$20 sps:$4 sm:$0xff]   ;;  %640 = vmatprep.mubr.bf16.mxu0 %v1149_v33  ;;  %v1156_v38 = vld [vmem:[%s1408_s7 + $0x34] ss:$20 sps:$4 sm:$0xff]   ;;  %v1159_v41 = vld [vmem:[%s1408_s7 + $0x30] ss:$20 sps:$4 sm:$0xff]  }
  0x1b   : > { %705 = vmatprep.mubr.bf16.mxu1 %v1152_v35  ;;  %v1154_v37 = vld [vmem:[%s1408_s7 + $0x2c] ss:$20 sps:$4 sm:$0xff]   ;;  %v1158_v40 = vld [vmem:[%s1408_s7 + $0x28] ss:$20 sps:$4 sm:$0xff]   ;;  %v1167_v44 = vld [vmem:[%s1521_s1 + $0x110] sm:$0xff]   ;;  %s1185_s25 = scalar_lea.vmem %s1184_s24, 2048 }
  0x1c   : > { %968 = vmatpush3.bf16.msra.mxu0 %v1129_v14  ;;  %v1161_v42 = vld [vmem:[%s1408_s7 + $0x54] ss:$20 sps:$4 sm:$0xff]   ;;  %v1163_v43 = vld [vmem:[%s1408_s7 + $0x5c] ss:$20 sps:$4 sm:$0xff]   ;;  %v1166_v47 = vld [vmem:[%s1408_s7 + $0x58] ss:$20 sps:$4 sm:$0xff]  }
  0x1d   : > { %1008 = vmatpush3.bf16.msra.mxu1 %v1130_v15  ;;  %969 = vmatprep.subr.bf16.mxu0 %v1131_v16  ;;  %v1174_v45 = vld [vmem:[%s1521_s1 + $0x118] sm:$0xff]   ;;  %v1165_v46 = vld [vmem:[%s1408_s7 + $0x50] ss:$20 sps:$4 sm:$0xff]   ;;  %v1173_v51 = vld [vmem:[%s1408_s7 + $0x80] ss:$20 sps:$4 sm:$0xff]  }
  0x1e   : > { %1009 = vmatprep.subr.bf16.mxu1 %v1132_v17  ;;  %v1168_v48 = vld [vmem:[%s1408_s7 + $0x7c] ss:$20 sps:$4 sm:$0xff]   ;;  %v1170_v49 = vld [vmem:[%s1408_s7 + $0x84] ss:$20 sps:$4 sm:$0xff]   ;;  %v1176_v53 = vld [vmem:[%s1408_s7 + $0x60] ss:$20 sps:$4 sm:$0xff]  }
  0x1f   : > { %v1172_v50 = vld [vmem:[%s1408_s7 + $0x78] ss:$20 sps:$4 sm:$0xff]   ;;  %v1175_v52 = vld [vmem:[%s1408_s7 + $0x10] ss:$20 sps:$4 sm:$0xff]   ;;  %v1178_v55 = vld [vmem:[%s1408_s7 + $0x88] ss:$20 sps:$4 sm:$0xff]  }
  0x20   : > { %970 = vmatpush3.bf16.msra.mxu0 %v1133_v18  ;;  %v1177_v54 = vld [vmem:[%s1408_s7 + $0x38] ss:$20 sps:$4 sm:$0xff]   ;;  %s166_s7 = scalar_lea.vmem [#allocation2], %s891_s9 }
  0x21   : > { %1010 = vmatpush3.bf16.msra.mxu1 %v1134_v19  ;;  %971 = vmatprep.subr.bf16.mxu0 %v1135_v20  ;;  %s825_s8 = sshll.u32 %s166_s7, 4  ;;  %s1470_s8 = int_to_ptr.vmem [resolvable:$true] %s825_s8 }
  0x22   : > { %1011 = vmatprep.subr.bf16.mxu1 %v1136_v21  ;;  %s1179_s19 = scalar_lea.vmem %s1470_s8, 1024  ;;  %p1186_p0 = scmp.lt.s32.totalorder %s1470_s8, %s1184_s24 }
  0x23   : > { %p1180_p11 = scmp.ne.s32.totalorder %s1470_s8, %s1179_s19  ;;  %p1187_p1 = scmp.lt.s32.totalorder %s1185_s25, %s1179_s19 }
  0x24   : > { %972 = vmatpush3.bf16.msra.mxu0 %v1137_v22 }
  0x25   : > { %1012 = vmatpush3.bf16.msra.mxu1 %v1138_v23  ;;  %973 = vmatprep.subr.bf16.mxu0 %v1139_v24  ;;  %p1181_p12 = pnand %p1180_p11, %p1304_p5  ;;  %p1188_p2 = por %p1187_p1, %p1186_p0 }
  0x26   : > { %1013 = vmatprep.subr.bf16.mxu1 %v1140_v25 }
  0x27   : > { %p1182_p13 = pneg %p1181_p12 }
  0x28   : > { %974 = vmatpush3.bf16.msra.mxu0 %v1141_v26 }
  0x29   : > { %1014 = vmatpush3.bf16.msra.mxu1 %v1142_v27  ;;  %975 = vmatprep.subr.bf16.mxu0 %v1143_v28  ;;  %p1189_p3 = pnand %p1188_p2, %p1182_p13 }
  0x2a   : > { %1015 = vmatprep.subr.bf16.mxu1 %v1144_v29 }
  0x2c   : > { %976 = vmatpush3.bf16.msra.mxu0 %v1145_v30 }
  0x2d   : > { %1016 = vmatpush3.bf16.msra.mxu1 %v1146_v31  ;;  %1049 = vmatprep.subr.bf16.mxu0 %v1153_v36 }
  0x2e   : > { %1065 = vmatprep.subr.bf16.mxu1 %v1153_v36 }
  0x2f   : > { %641 = vmatmul.mubr.bf16.vlgmr.msra.gmra.mrb[0].mxu0 %v1147_v32 }
  0x30   : > { %706 = vmatmul.mubr.bf16.vlgmr.msra.gmra.mrb[0].mxu1 %v1150_v34  ;;  %1050 = vmatpush3.bf16.msra.mxu0 %v1153_v36 }
  0x31   : > { %1069 = vmatpush3.bf16.msra.mxu1 %v1153_v36  ;;  %648 = vmatprep.mubr.bf16.mxu0 %v1154_v37 }
  0x32   : > { %713 = vmatprep.mubr.bf16.mxu1 %v1156_v38  ;;  %1051 = vmatprep.subr.bf16.mxu0 %v1160_v39 }
  0x33   : > { %1066 = vmatprep.subr.bf16.mxu1 %v1160_v39 }
  0x34   : > { %1052 = vmatpush3.bf16.msra.mxu0 %v1160_v39 }
  0x35   : > { %1070 = vmatpush3.bf16.msra.mxu1 %v1160_v39  ;;  %1053 = vmatprep.subr.bf16.mxu0 %v1167_v44 }
  0x36   : > { %1067 = vmatprep.subr.bf16.mxu1 %v1167_v44 }
  0x37   : > { %649 = vmatmul.mubr.bf16.gmra.mrb[4].mxu0 %v1158_v40 }
  0x38   : > { %714 = vmatmul.mubr.bf16.gmra.mrb[4].mxu1 %v1159_v41  ;;  %656 = vmatprep.mubr.bf16.mxu0 %v1161_v42 }
  0x39   : > { %721 = vmatprep.mubr.bf16.mxu1 %v1163_v43  ;;  %1054 = vmatpush3.bf16.msra.mxu0 %v1167_v44 }
  0x3a   : > { %1071 = vmatpush3.bf16.msra.mxu1 %v1167_v44  ;;  %1055 = vmatprep.subr.bf16.mxu0 %v1174_v45 }
  0x3b   : > { %1068 = vmatprep.subr.bf16.mxu1 %v1174_v45 }
  0x3d   : > { %1056 = vmatpush3.bf16.msra.mxu0 %v1174_v45 }
  0x3e   : > { %1072 = vmatpush3.bf16.msra.mxu1 %v1174_v45 }
  0x3f   : > { %657 = vmatmul.mubr.bf16.gmra.mrb[8].mxu0 %v1165_v46 }
  0x40   : > { %722 = vmatmul.mubr.bf16.gmra.mrb[8].mxu1 %v1166_v47  ;;  %664 = vmatprep.mubr.bf16.mxu0 %v1168_v48 }
  0x41   : > { %729 = vmatprep.mubr.bf16.mxu1 %v1170_v49 }
  0x47   : > { %665 = vmatmul.mubr.bf16.gmra.mrb[12].mxu0 %v1172_v50 }
  0x48   : > { %730 = vmatmul.mubr.bf16.gmra.mrb[12].mxu1 %v1173_v51  ;;  %1057 = vmatprep.mubr.msk.bf16.mxu0 %vm595_vm0, %v1175_v52 }
  0x49   : > { %1061 = vmatprep.mubr.msk.bf16.mxu1 %vm595_vm0, %v1176_v53 }
  0x4f   : > { %1058 = vmatmul.mubr.msk.bf16.vlgmr.msra.gmra.mrb[16].mxu0 %vm595_vm0, %v1177_v54 }
  0x50   : > { %1062 = vmatmul.mubr.msk.bf16.vlgmr.msra.gmra.mrb[16].mxu1 %vm595_vm0, %v1178_v55 }
 0x102   : > { %v977_v56 = vpop.f32.mrb[0].mxu0 }
 0x103   : > { %v1017_v57 = vpop.f32.mrb[0].mxu1  ;;  %v978_v59 = vpop.f32.mrb[1].mxu0 }
 0x104   : > { %v979_v60 = vadd.f32 %v978_v59, %v977_v56  ;;  %v1018_v61 = vpop.f32.mrb[1].mxu1  ;;  %v980_v62 = vpop.f32.mrb[2].mxu0 }
 0x105   : > { %v1019_v63 = vadd.f32 %v1018_v61, %v1017_v57  ;;  %v1020_v0 = vpop.f32.mrb[2].mxu1  ;;  %v981_v1 = vpop.f32.mrb[3].mxu0 }
 0x106   : > { %v643_v2 = vadd.f32 %v979_v60, %v894_v58  ;;  %v982_v3 = vadd.f32 %v981_v1, %v980_v62  ;;  %v1021_v4 = vpop.f32.mrb[3].mxu1 }
 0x107   : > { %v1022_v5 = vadd.f32 %v1021_v4, %v1020_v0 }
 0x108   : > { %v646_v6 = vadd.f32 %v982_v3, %v894_v58  ;;  %v708_v7 = vadd.f32 %v1019_v63, %v643_v2 }
 0x10a   : > { %v983_v8 = vpop.f32.mrb[4].mxu0  ;;  %v1455_v9 = vadd.f32 %v1022_v5, %v646_v6 }
 0x10b   : > { %v1023_v10 = vpop.f32.mrb[4].mxu1  ;;  %v984_v11 = vpop.f32.mrb[5].mxu0 }
 0x10c   : > { %v985_v12 = vadd.f32 %v984_v11, %v983_v8  ;;  %v1024_v13 = vpop.f32.mrb[5].mxu1  ;;  %v986_v14 = vpop.f32.mrb[6].mxu0 }
 0x10d   : > { %v1025_v15 = vadd.f32 %v1024_v13, %v1023_v10  ;;  %v1026_v16 = vpop.f32.mrb[6].mxu1  ;;  %v987_v17 = vpop.f32.mrb[7].mxu0 }
 0x10e   : > { %v651_v18 = vadd.f32 %v985_v12, %v894_v58  ;;  %v988_v19 = vadd.f32 %v987_v17, %v986_v14  ;;  %v1027_v20 = vpop.f32.mrb[7].mxu1 }
 0x10f   : > { %v1028_v21 = vadd.f32 %v1027_v20, %v1026_v16 }
 0x110   : > { %v654_v22 = vadd.f32 %v988_v19, %v894_v58  ;;  %v716_v23 = vadd.f32 %v1025_v15, %v651_v18 }
 0x112   : > { %v989_v24 = vpop.f32.mrb[8].mxu0  ;;  %v719_v25 = vadd.f32 %v1028_v21, %v654_v22 }
 0x113   : > { %v1029_v26 = vpop.f32.mrb[8].mxu1  ;;  %v990_v27 = vpop.f32.mrb[9].mxu0 }
 0x114   : > { %v991_v28 = vadd.f32 %v990_v27, %v989_v24  ;;  %v1030_v29 = vpop.f32.mrb[9].mxu1  ;;  %v992_v30 = vpop.f32.mrb[10].mxu0 }
 0x115   : > { %v1031_v31 = vadd.f32 %v1030_v29, %v1029_v26  ;;  %v1032_v32 = vpop.f32.mrb[10].mxu1  ;;  %v993_v33 = vpop.f32.mrb[11].mxu0 }
 0x116   : > { %v659_v34 = vadd.f32 %v991_v28, %v894_v58  ;;  %v994_v35 = vadd.f32 %v993_v33, %v992_v30  ;;  %v1033_v36 = vpop.f32.mrb[11].mxu1 }
 0x117   : > { %v1034_v37 = vadd.f32 %v1033_v36, %v1032_v32 }
 0x118   : > { %v662_v38 = vadd.f32 %v994_v35, %v894_v58  ;;  %v724_v39 = vadd.f32 %v1031_v31, %v659_v34 }
 0x11a   : > { %v995_v40 = vpop.f32.mrb[12].mxu0  ;;  %v727_v41 = vadd.f32 %v1034_v37, %v662_v38 }
 0x11b   : > { %v1035_v42 = vpop.f32.mrb[12].mxu1  ;;  %v996_v43 = vpop.f32.mrb[13].mxu0 }
 0x11c   : > { %v997_v44 = vadd.f32 %v996_v43, %v995_v40  ;;  %v1036_v45 = vpop.f32.mrb[13].mxu1  ;;  %v998_v46 = vpop.f32.mrb[14].mxu0 }
 0x11d   : > { %v1037_v47 = vadd.f32 %v1036_v45, %v1035_v42  ;;  %v1038_v48 = vpop.f32.mrb[14].mxu1  ;;  %v999_v49 = vpop.f32.mrb[15].mxu0 }
 0x11e   : > { %v667_v50 = vadd.f32 %v997_v44, %v894_v58  ;;  %v1000_v51 = vadd.f32 %v999_v49, %v998_v46  ;;  %v1039_v52 = vpop.f32.mrb[15].mxu1 }
 0x11f   : > { %v1040_v53 = vadd.f32 %v1039_v52, %v1038_v48 }
 0x120   : > { %v670_v54 = vadd.f32 %v1000_v51, %v894_v58  ;;  %v732_v55 = vadd.f32 %v1037_v47, %v667_v50 }
 0x122   : > { %v1059_v56 = vpop.f32.mrb[16].mxu0  ;;  %v735_v57 = vadd.f32 %v1040_v53, %v670_v54 }
 0x123   : > { %v781_v59 = vadd.f32 %v1059_v56, %v716_v23  ;;  %v1063_v60 = vpop.f32.mrb[16].mxu1  ;;  %v772_v61 = vpop.f32.mrb[17].mxu0 }
 0x124   : > { %v797_v62 = vadd.f32 %v1063_v60, %v732_v55  ;;  %v773_v63 = vadd.f32 %v772_v61, %v708_v7  ;;  %v788_v0 = vpop.f32.mrb[17].mxu1  ;;  %v1060_v1 = vpop.f32.mrb[18].mxu0 }
 0x125   : > { %805 = vst.msk [vmem:[%s166_s7 + $0x10] sm:$0xff] %vm595_vm0, %v781_v59  ;;  %v789_v2 = vadd.f32 %v788_v0, %v724_v39  ;;  %v784_v3 = vadd.f32 %v1060_v1, %v719_v25  ;;  %v1064_v4 = vpop.f32.mrb[18].mxu1  ;;  %v775_v58 = vpop.f32.mrb[19].mxu0 }
 0x126   : > { %809 = vst.msk [vmem:[%s166_s7 + $0x30] sm:$0xff] %vm595_vm0, %v797_v62  ;;  %803 = vst.msk [vmem:[%s166_s7] sm:$0xff] %vm595_vm0, %v773_v63  ;;  %v800_v5 = vadd.f32 %v1064_v4, %v735_v57  ;;  %v776_v6 = vadd.f32 %v775_v58, %v1455_v9  ;;  %v791_v8 = vpop.f32.mrb[19].mxu1 }
 0x127   : > { %807 = vst.msk [vmem:[%s166_s7 + $0x20] sm:$0xff] %vm595_vm0, %v789_v2  ;;  %806 = vst.msk [vmem:[%s166_s7 + $0x18] sm:$0xff] %vm595_vm0, %v784_v3  ;;  %v792_v7 = vadd.f32 %v791_v8, %v727_v41 }
 0x128   : > { %810 = vst.msk [vmem:[%s166_s7 + $0x38] sm:$0xff] %vm595_vm0, %v800_v5  ;;  %804 = vst.msk [vmem:[%s166_s7 + $0x8] sm:$0xff] %vm595_vm0, %v776_v6 }
 0x129   : > { %808 = vst.msk [vmem:[%s166_s7 + $0x28] sm:$0xff] %vm595_vm0, %v792_v7 }
 0x12a   : > { %1192 = shalt.err (!%p1189_p3)
}
 0x12b   : > { %s1193_s26 = scalar_lea.hbm %s1468_s11, 1024  ;;  %s1197_s29 = scalar_lea.hbm %s1523_s3, 2048 }
 0x12c   : > { %p1194_p4 = scmp.ne.s32.totalorder %s1468_s11, %s1193_s26  ;;  %p1198_p9 = scmp.lt.u32.totalorder %s1468_s11, %s1523_s3 }
 0x12d   : > { %p1199_p10 = scmp.lt.u32.totalorder %s1197_s29, %s1193_s26  ;;  %p1201_p12 = scmp.lt.u32.totalorder %s1193_s26, %s1468_s11 }
 0x12e   : > { %p1195_p7 = pnand %p1194_p4, %p1304_p5 }
 0x12f   : > { %p1200_p11 = por %p1199_p10, %p1198_p9 }
 0x130   : > { %p1196_p8 = pneg %p1195_p7 }
 0x131   : > { %p1202_p13 = por %p1201_p12, %p1200_p11 }
 0x133   : > { %p1203_p0 = pnand %p1202_p13, %p1196_p8 }
 0x135   : > { %1206 = shalt.err (!%p1203_p0)
}
 0x136   : > { %s1244_s5 = smov 128   ;;  %s1245_s9 = smov 8  }
 0x137   : > { %1074 = dma.vmem_to_hbm [thread:$0]  (%p1304_p5), %s1470_s8, 1024, %s1468_s11, %s1479_s17, %s1244_s5, %s1244_s5, %s1245_s9  }
 0x138 PF: > { %p1080_p1 = scmp.ge.s32.totalorder %s1241_s15, 2  ;;  %s840_s6 = sand.u32 1, %s1229_s12  }
 0x139   : > { %s841_s7 = scalar_lea.sflag [#allocation3], %s840_s6 }
 0x13a   : > { %p1077_p2 = pnand %p1080_p1, %p1308_p6 }
 0x13c   : > { %1224 = dma.done.wait (!%p1077_p2), %s841_s7, 1024  }
 0x13d   : > { %1226 = vsyncadd (!%p1077_p2), %s841_s7, 4294966272  ;;  %p13_p3 = scmp.ge.s32.totalorder %s1291_s18, 4   ;;  %s1526_s12 = smov %s1233_s13 }
 0x13e   : > { %s1527_s13 = smov %s1237_s14  ;;  %s1528_s14 = smov %s1302_s21 }
 0x13f   : > { %s1529_s15 = smov %s1291_s18  ;;  %15 = sbr.rel (!%p13_p3) target bundleno = 3 (0x3), region = 67 }
 0x146   :  { %846 = vsyncpa [#allocation3], 1 }
 0x147   :  { %848 = vsyncpa [#allocation3 + $0x1], 1 }

</bundles_post_ra>
